<compile_context>
chip_gen: v6e
topology: v6e:2x2x1
jax: 0.10.0
libtpu: 0.0.40
codegen_flags: <defaults>
</compile_context>

<pallas_src>
import functools

import jax
import jax.numpy as jnp
import numpy as np
from jax.experimental import pallas as pl
from jax.experimental.pallas import tpu as pltpu


def _linear_attn_ffn_kernel(x_ref, s1_ref, h1_ref, wkvq_ref, bkvq_ref,
                            wout_ref, bout_ref, s2_ref, h2_ref,
                            w1_ref, w2_ref, b2_ref, seg_ref, segT_ref,
                            o_ref, *, embed_dim):
    C = embed_dim
    x = x_ref[0]                                     # (C, Mb) f32, channel-first

    # ---- pre_norm_attn: BatchNorm2d (eval) folded to per-channel affine ------
    y = x * s1_ref[...] + h1_ref[...]                # (C,1) broadcast over lanes
    y_bf = y.astype(jnp.bfloat16)

    # Fused qkv 1x1 conv, channel-first: (2C+pad, C) @ (C, Mb) on the MXU.
    # Rows ordered [key | value | query | zero-pad] so the slices below are
    # sublane slices at 8-aligned offsets (C % 8 == 0 for real model widths).
    qkv = jnp.dot(wkvq_ref[...], y_bf,
                  preferred_element_type=jnp.float32) + bkvq_ref[...]
    key = qkv[:C, :]                                 # (C, Mb)
    val = qkv[C:2 * C, :]                            # (C, Mb)
    q = qkv[2 * C:2 * C + 1, :]                      # (1, Mb) — tokens on lanes

    # Softmax over the patch axis within each (batch, pixel) group.  Subtracting
    # the block-global max is exact (softmax is shift-invariant per group) and
    # keeps exp() in range; exp runs lane-dense on the EUP.
    e = jnp.exp(q - jnp.max(q, axis=1, keepdims=True))           # (1, Mb)

    # Per-group reductions + broadcast via segment-indicator matmuls (MXU):
    #   seg[m, p] = 1  iff token m belongs to pixel-group p      (Mb, TPb)
    #   segT      = seg^T                                        (TPb, Mb)
    denom_p = jnp.dot(e, seg_ref[...],
                      preferred_element_type=jnp.float32)        # (1, TPb)
    kesum_p = jnp.dot(key * e, seg_ref[...],
                      preferred_element_type=jnp.float32)        # (C, TPb)
    ctx_p = kesum_p / denom_p                                    # exact division
    ctx = jnp.dot(ctx_p, segT_ref[...],
                  preferred_element_type=jnp.float32)            # (C, Mb)
    attn = jnp.maximum(val, 0.0) * ctx                           # relu(V) * ctx

    # out_proj 1x1 conv (MXU, bf16 operands, f32 accumulation); Dropout = id.
    attn_out = jnp.dot(wout_ref[...], attn.astype(jnp.bfloat16),
                       preferred_element_type=jnp.float32) + bout_ref[...]
    x1 = x + attn_out                                            # residual

    # ---- pre_norm_ffn --------------------------------------------------------
    # TODO(synk): optionally keep large intermediates (qkv, h, attn) in bf16 on
    # v6e/v7x (bf16 VPU) for VMEM headroom; kept f32 here for v5e compatibility.
    z = x1 * s2_ref[...] + h2_ref[...]                           # BatchNorm2d (eval)
    h = jnp.dot(w1_ref[...], z.astype(jnp.bfloat16),
                preferred_element_type=jnp.float32)              # (F, Mb)
    # tanh-GELU runs on the EUP; |tanh - erf| < 1e-3 abs, within tolerance.
    h = jax.nn.gelu(h, approximate=True)
    ffn = jnp.dot(w2_ref[...], h.astype(jnp.bfloat16),
                  preferred_element_type=jnp.float32) + b2_ref[...]

    o_ref[0] = x1 + ffn                                          # second residual


def _fold_bn(gamma, beta, mean, var, eps):
    scale = gamma / jnp.sqrt(var + eps)
    shift = beta - mean * scale
    return scale, shift


def prepare_params(params, bn_eps=1e-5):
    """Fold BatchNorm running stats and cast matmul weights to bf16 ONCE
    (parameter-load time).  bn_eps must match the PyTorch BatchNorm2d eps."""
    C = params['wout'].shape[0]
    s1, h1 = _fold_bn(params['bn1_gamma'], params['bn1_beta'],
                      params['bn1_mean'], params['bn1_var'], bn_eps)
    s2, h2 = _fold_bn(params['bn2_gamma'], params['bn2_beta'],
                      params['bn2_mean'], params['bn2_var'], bn_eps)

    # qkv_proj weight is PyTorch-style (1+2C, C) with rows ordered [q | k | v];
    # reorder to [k | v | q] and zero-pad rows to a multiple of 8 so in-kernel
    # sublane slices land at aligned offsets.
    wqkv = jnp.asarray(params['wqkv'], jnp.float32)
    bqkv = jnp.asarray(params['bqkv'], jnp.float32)
    wkvq = jnp.concatenate([wqkv[1:1 + C], wqkv[1 + C:], wqkv[0:1]], axis=0)
    bkvq = jnp.concatenate([bqkv[1:1 + C], bqkv[1 + C:], bqkv[0:1]], axis=0)
    pad_rows = (-wkvq.shape[0]) % 8
    if pad_rows:
        wkvq = jnp.concatenate(
            [wkvq, jnp.zeros((pad_rows, C), wkvq.dtype)], axis=0)
        bkvq = jnp.concatenate(
            [bkvq, jnp.zeros((pad_rows,), bkvq.dtype)], axis=0)

    col = lambda v: jnp.asarray(v, jnp.float32).reshape(-1, 1)
    return {
        's1': col(s1), 'h1': col(h1),
        'wkvq': wkvq.astype(jnp.bfloat16), 'bkvq': col(bkvq),
        'wout': jnp.asarray(params['wout'], jnp.bfloat16),
        'bout': col(params['bout']),
        's2': col(s2), 'h2': col(h2),
        'w1': jnp.asarray(params['w1'], jnp.bfloat16),
        'w2': jnp.asarray(params['w2'], jnp.bfloat16),
        'b2': col(params['b2']),
    }


def _vmem_capacity_bytes():
    try:
        return int(pltpu.get_tpu_info().vmem_capacity_bytes)
    except Exception:                      # interpret mode / older runtimes
        return 64 * 1024 * 1024            # conservative (v7x-class) default


def _choose_token_tile(P, N, max_tokens):
    """Largest token tile made of whole (pixel) softmax groups, 128-lane
    aligned whenever the token axis is actually tiled."""
    M = P * N
    if M <= max_tokens:
        return M
    for tp in range(P, 0, -1):
        mb = tp * N
        if P % tp == 0 and mb <= max_tokens and mb % 128 == 0:
            return mb
    return M                               # fallback: full token extent


def linear_attn_ffn(x_bcpn, prep):
    """x_bcpn: (B, C, P, N) float32, same convention as the PyTorch module.
    prep: output of prepare_params()."""
    B, C, P, N = x_bcpn.shape
    M = P * N
    F_dim = prep['w1'].shape[0]

    # Channel-first throughout: merging the trailing (P, N) dims is a free
    # metadata reshape — no HBM transpose passes on input or output.
    x3 = x_bcpn.reshape(B, C, M)

    vmem_cap = _vmem_capacity_bytes()
    small_vmem = vmem_cap <= 64 * 1024 * 1024          # v7x-class parts
    max_tokens = 512 if small_vmem else 1024
    vmem_limit = int(min(vmem_cap - 24 * 1024 * 1024, 64 * 1024 * 1024))

    Mb = _choose_token_tile(P, N, max_tokens)
    TPb = Mb // N
    n_t = M // Mb

    # Segment-indicator matrices (token -> pixel-group membership in a block).
    pidx = np.arange(Mb) // N
    seg = jnp.asarray(pidx[:, None] == np.arange(TPb)[None, :], jnp.float32)
    segT = jnp.asarray(pidx[None, :] == np.arange(TPb)[:, None], jnp.float32)

    operands = (
        x3,
        prep['s1'], prep['h1'], prep['wkvq'], prep['bkvq'],
        prep['wout'], prep['bout'], prep['s2'], prep['h2'],
        prep['w1'], prep['w2'], prep['b2'],
        seg, segT,
    )

    def _const_spec(shape):
        index_map = lambda b, t: (0,) * len(shape)
        try:   # single-buffer grid-invariant weights/biases (VMEM headroom)
            return pl.BlockSpec(shape, index_map, pipeline_mode=pl.Buffered(1))
        except (AttributeError, TypeError, ValueError):
            return pl.BlockSpec(shape, index_map)

    in_specs = [pl.BlockSpec((1, C, Mb), lambda b, t: (b, 0, t))]
    in_specs += [_const_spec(op.shape) for op in operands[1:]]

    kernel = functools.partial(_linear_attn_ffn_kernel, embed_dim=C)

    # Advisory cost estimate (helps XLA schedule around the custom call).
    tokens = B * M
    flops = 2 * tokens * (C * (2 * C + 1) + C * C + 2 * C * F_dim + 3 * C)
    transcendentals = tokens * (1 + F_dim)
    bytes_accessed = 2 * 4 * tokens * C + 2 * (
        (2 * C + 8) * C + C * C + 2 * C * F_dim)

    out3 = pl.pallas_call(
        kernel,
        out_shape=jax.ShapeDtypeStruct((B, C, M), jnp.float32),
        grid_spec=pltpu.PrefetchScalarGridSpec(
            num_scalar_prefetch=0,
            grid=(B, n_t),
            in_specs=in_specs,
            out_specs=pl.BlockSpec((1, C, Mb), lambda b, t: (b, 0, t)),
        ),
        compiler_params=pltpu.CompilerParams(
            dimension_semantics=("parallel", "parallel"),
            vmem_limit_bytes=vmem_limit,
        ),
        cost_estimate=pl.CostEstimate(
            flops=int(flops),
            transcendentals=int(transcendentals),
            bytes_accessed=int(bytes_accessed)),
    )(*operands)

    return out3.reshape(B, C, P, N)


def _reference(x, params, bn_eps=1e-5):
    """Pure-JAX reference of the module forward (f32, exact-erf GELU)."""
    C = x.shape[1]

    def bn(v, g, b, m, var):
        s = g / jnp.sqrt(var + bn_eps)
        h = b - m * s
        return v * s[None, :, None, None] + h[None, :, None, None]

    y = bn(x, params['bn1_gamma'], params['bn1_beta'],
           params['bn1_mean'], params['bn1_var'])
    qkv = jnp.einsum('oc,bcpn->bopn', params['wqkv'], y) \
        + params['bqkv'][None, :, None, None]
    q, k, v = qkv[:, 0:1], qkv[:, 1:1 + C], qkv[:, 1 + C:]
    scores = jax.nn.softmax(q, axis=-1)
    ctx = jnp.sum(k * scores, axis=-1, keepdims=True)
    attn = jnp.maximum(v, 0.0) * ctx
    attn = jnp.einsum('oc,bcpn->bopn', params['wout'], attn) \
        + params['bout'][None, :, None, None]
    x1 = x + attn
    z = bn(x1, params['bn2_gamma'], params['bn2_beta'],
           params['bn2_mean'], params['bn2_var'])
    h = jax.nn.gelu(jnp.einsum('fc,bcpn->bfpn', params['w1'], z),
                    approximate=False)
    ffn = jnp.einsum('cf,bfpn->bcpn', params['w2'], h) \
        + params['b2'][None, :, None, None]
    return x1 + ffn


if __name__ == "__main__":
    B, C, P, N = 2, 16, 4, 16        # (batch, embed_dim, pixels/patch, patches)
    F_dim = 32                       # ffn_latent_dim

    key = jax.random.PRNGKey(0)
    keys = jax.random.split(key, 16)

    params = {
        # BatchNorm2d #1 (pre_norm_attn[0]) — eval-mode running stats
        'bn1_gamma': 1.0 + 0.1 * jax.random.normal(keys[0], (C,), jnp.float32),
        'bn1_beta': 0.1 * jax.random.normal(keys[1], (C,), jnp.float32),
        'bn1_mean': 0.05 * jax.random.normal(keys[2], (C,), jnp.float32),
        'bn1_var': 1.0 + 0.1 * jax.random.uniform(keys[3], (C,), jnp.float32),
        # LinearSelfAttention: qkv_proj (C -> 1+2C) and out_proj (C -> C), 1x1
        # convs stored PyTorch-style as (out_channels, in_channels)
        'wqkv': 0.1 * jax.random.normal(keys[4], (1 + 2 * C, C), jnp.float32),
        'bqkv': 0.05 * jax.random.normal(keys[5], (1 + 2 * C,), jnp.float32),
        'wout': 0.1 * jax.random.normal(keys[6], (C, C), jnp.float32),
        'bout': 0.05 * jax.random.normal(keys[7], (C,), jnp.float32),
        # BatchNorm2d #2 (pre_norm_ffn[0])
        'bn2_gamma': 1.0 + 0.1 * jax.random.normal(keys[8], (C,), jnp.float32),
        'bn2_beta': 0.1 * jax.random.normal(keys[9], (C,), jnp.float32),
        'bn2_mean': 0.05 * jax.random.normal(keys[10], (C,), jnp.float32),
        'bn2_var': 1.0 + 0.1 * jax.random.uniform(keys[11], (C,), jnp.float32),
        # FFN: Conv2d(C, F, bias=False), Conv2d(F, C, bias=True)
        'w1': 0.1 * jax.random.normal(keys[12], (F_dim, C), jnp.float32),
        'w2': 0.1 * jax.random.normal(keys[13], (C, F_dim), jnp.float32),
        'b2': 0.05 * jax.random.normal(keys[14], (C,), jnp.float32),
    }

    x = jax.random.normal(keys[15], (B, C, P, N), jnp.float32)

    prep = prepare_params(params)                 # one-time fold / bf16 cast
    out = jax.block_until_ready(linear_attn_ffn(x, prep))
    ref = jax.block_until_ready(_reference(x, params))

    # Tolerance covers bf16 MXU operands + tanh-GELU (softmax is now exact).
    np.testing.assert_allclose(np.asarray(out), np.asarray(ref),
                               rtol=2e-2, atol=2e-2)
    assert out.shape == x.shape and out.dtype == jnp.float32
    print("KERNEL_OK")
</pallas_src>

<mosaic_0001>
module attributes {stable_mosaic.version = 11 : i64} {
  func.func @_linear_attn_ffn_kernel(%arg0: i32, %arg1: i32, %arg2: memref<1x16x64xf32, #tpu.memory_space<vmem>>, %arg3: memref<16x1xf32, #tpu.memory_space<vmem>>, %arg4: memref<16x1xf32, #tpu.memory_space<vmem>>, %arg5: memref<40x16xbf16, #tpu.memory_space<vmem>>, %arg6: memref<40x1xf32, #tpu.memory_space<vmem>>, %arg7: memref<16x16xbf16, #tpu.memory_space<vmem>>, %arg8: memref<16x1xf32, #tpu.memory_space<vmem>>, %arg9: memref<16x1xf32, #tpu.memory_space<vmem>>, %arg10: memref<16x1xf32, #tpu.memory_space<vmem>>, %arg11: memref<32x16xbf16, #tpu.memory_space<vmem>>, %arg12: memref<16x32xbf16, #tpu.memory_space<vmem>>, %arg13: memref<16x1xf32, #tpu.memory_space<vmem>>, %arg14: memref<64x4xf32, #tpu.memory_space<vmem>>, %arg15: memref<4x64xf32, #tpu.memory_space<vmem>>, %arg16: memref<1x16x64xf32, #tpu.memory_space<vmem>>) attributes {dimension_semantics = [#tpu.dimension_semantics<parallel>, #tpu.dimension_semantics<parallel>], iteration_bounds = array<i64: 2, 1>, scalar_prefetch = 0 : i64, scratch_operands = 0 : i64, tpu.core_type = #tpu.core_type<tc>, window_params = [{transform_indices = @transform_0, window_bounds = array<i64: 1, 16, 64>}, {pipeline_mode = #tpu.pipeline_mode<synchronous>, transform_indices = @transform_1, window_bounds = array<i64: 16, 1>}, {pipeline_mode = #tpu.pipeline_mode<synchronous>, transform_indices = @transform_2, window_bounds = array<i64: 16, 1>}, {pipeline_mode = #tpu.pipeline_mode<synchronous>, transform_indices = @transform_3, window_bounds = array<i64: 40, 16>}, {pipeline_mode = #tpu.pipeline_mode<synchronous>, transform_indices = @transform_4, window_bounds = array<i64: 40, 1>}, {pipeline_mode = #tpu.pipeline_mode<synchronous>, transform_indices = @transform_5, window_bounds = array<i64: 16, 16>}, {pipeline_mode = #tpu.pipeline_mode<synchronous>, transform_indices = @transform_6, window_bounds = array<i64: 16, 1>}, {pipeline_mode = #tpu.pipeline_mode<synchronous>, transform_indices = @transform_7, window_bounds = array<i64: 16, 1>}, {pipeline_mode = #tpu.pipeline_mode<synchronous>, transform_indices = @transform_8, window_bounds = array<i64: 16, 1>}, {pipeline_mode = #tpu.pipeline_mode<synchronous>, transform_indices = @transform_9, window_bounds = array<i64: 32, 16>}, {pipeline_mode = #tpu.pipeline_mode<synchronous>, transform_indices = @transform_10, window_bounds = array<i64: 16, 32>}, {pipeline_mode = #tpu.pipeline_mode<synchronous>, transform_indices = @transform_11, window_bounds = array<i64: 16, 1>}, {pipeline_mode = #tpu.pipeline_mode<synchronous>, transform_indices = @transform_12, window_bounds = array<i64: 64, 4>}, {pipeline_mode = #tpu.pipeline_mode<synchronous>, transform_indices = @transform_13, window_bounds = array<i64: 4, 64>}, {transform_indices = @transform_14, window_bounds = array<i64: 1, 16, 64>}]} {
    %c0 = arith.constant 0 : index
    %c0_0 = arith.constant 0 : index
    %c0_1 = arith.constant 0 : index
    %0 = vector.load %arg2[%c0, %c0_0, %c0_1] : memref<1x16x64xf32, #tpu.memory_space<vmem>>, vector<1x16x64xf32>
    %1 = vector.shape_cast %0 : vector<1x16x64xf32> to vector<16x64xf32>
    %c0_2 = arith.constant 0 : index
    %c0_3 = arith.constant 0 : index
    %2 = vector.load %arg3[%c0_2, %c0_3] : memref<16x1xf32, #tpu.memory_space<vmem>>, vector<16x1xf32>
    %3 = vector.broadcast %2 : vector<16x1xf32> to vector<16x64xf32>
    %4 = arith.mulf %1, %3 : vector<16x64xf32>
    %c0_4 = arith.constant 0 : index
    %c0_5 = arith.constant 0 : index
    %5 = vector.load %arg4[%c0_4, %c0_5] : memref<16x1xf32, #tpu.memory_space<vmem>>, vector<16x1xf32>
    %6 = vector.broadcast %5 : vector<16x1xf32> to vector<16x64xf32>
    %7 = arith.addf %4, %6 : vector<16x64xf32>
    %8 = arith.truncf %7 : vector<16x64xf32> to vector<16x64xbf16>
    %c0_6 = arith.constant 0 : index
    %c0_7 = arith.constant 0 : index
    %9 = vector.load %arg5[%c0_6, %c0_7] : memref<40x16xbf16, #tpu.memory_space<vmem>>, vector<40x16xbf16>
    %cst = arith.constant dense<0.000000e+00> : vector<40x64xf32>
    %10 = tpu.matmul %9, %8, %cst {dimension_numbers = #tpu.dot_dimension_numbers<[1], [0], [0], [1], [0, 0, 1, 1], [], []>} : vector<40x16xbf16>, vector<16x64xbf16>, vector<40x64xf32> -> vector<40x64xf32>
    %c0_8 = arith.constant 0 : index
    %c0_9 = arith.constant 0 : index
    %11 = vector.load %arg6[%c0_8, %c0_9] : memref<40x1xf32, #tpu.memory_space<vmem>>, vector<40x1xf32>
    %12 = vector.broadcast %11 : vector<40x1xf32> to vector<40x64xf32>
    %13 = arith.addf %10, %12 : vector<40x64xf32>
    %14 = vector.extract_strided_slice %13 {offsets = [0, 0], sizes = [16, 64], strides = [1, 1]} : vector<40x64xf32> to vector<16x64xf32>
    %15 = vector.extract_strided_slice %13 {offsets = [16, 0], sizes = [16, 64], strides = [1, 1]} : vector<40x64xf32> to vector<16x64xf32>
    %16 = vector.extract_strided_slice %13 {offsets = [32, 0], sizes = [1, 64], strides = [1, 1]} : vector<40x64xf32> to vector<1x64xf32>
    %cst_10 = arith.constant dense<0xFF800000> : vector<1xf32>
    %17 = vector.multi_reduction <maximumf>, %16, %cst_10 [1] : vector<1x64xf32> to vector<1xf32>
    %18 = vector.shape_cast %17 : vector<1xf32> to vector<1x1xf32>
    %19 = vector.broadcast %18 : vector<1x1xf32> to vector<1x64xf32>
    %20 = arith.subf %16, %19 : vector<1x64xf32>
    %21 = math.exp %20 : vector<1x64xf32>
    %c0_11 = arith.constant 0 : index
    %c0_12 = arith.constant 0 : index
    %22 = vector.load %arg14[%c0_11, %c0_12] : memref<64x4xf32, #tpu.memory_space<vmem>>, vector<64x4xf32>
    %cst_13 = arith.constant dense<0.000000e+00> : vector<1x4xf32>
    %23 = tpu.matmul %21, %22, %cst_13 {dimension_numbers = #tpu.dot_dimension_numbers<[1], [0], [0], [1], [0, 0, 1, 1], [], []>} : vector<1x64xf32>, vector<64x4xf32>, vector<1x4xf32> -> vector<1x4xf32>
    %24 = vector.broadcast %21 : vector<1x64xf32> to vector<16x64xf32>
    %25 = arith.mulf %14, %24 : vector<16x64xf32>
    %c0_14 = arith.constant 0 : index
    %c0_15 = arith.constant 0 : index
    %26 = vector.load %arg14[%c0_14, %c0_15] : memref<64x4xf32, #tpu.memory_space<vmem>>, vector<64x4xf32>
    %cst_16 = arith.constant dense<0.000000e+00> : vector<16x4xf32>
    %27 = tpu.matmul %25, %26, %cst_16 {dimension_numbers = #tpu.dot_dimension_numbers<[1], [0], [0], [1], [0, 0, 1, 1], [], []>} : vector<16x64xf32>, vector<64x4xf32>, vector<16x4xf32> -> vector<16x4xf32>
    %28 = vector.broadcast %23 : vector<1x4xf32> to vector<16x4xf32>
    %29 = arith.divf %27, %28 : vector<16x4xf32>
    %c0_17 = arith.constant 0 : index
    %c0_18 = arith.constant 0 : index
    %30 = vector.load %arg15[%c0_17, %c0_18] : memref<4x64xf32, #tpu.memory_space<vmem>>, vector<4x64xf32>
    %cst_19 = arith.constant dense<0.000000e+00> : vector<16x64xf32>
    %31 = tpu.matmul %29, %30, %cst_19 {dimension_numbers = #tpu.dot_dimension_numbers<[1], [0], [0], [1], [0, 0, 1, 1], [], []>} : vector<16x4xf32>, vector<4x64xf32>, vector<16x64xf32> -> vector<16x64xf32>
    %cst_20 = arith.constant 0.000000e+00 : f32
    %32 = vector.broadcast %cst_20 : f32 to vector<16x64xf32>
    %33 = arith.maximumf %15, %32 : vector<16x64xf32>
    %34 = arith.mulf %33, %31 : vector<16x64xf32>
    %c0_21 = arith.constant 0 : index
    %c0_22 = arith.constant 0 : index
    %35 = vector.load %arg7[%c0_21, %c0_22] : memref<16x16xbf16, #tpu.memory_space<vmem>>, vector<16x16xbf16>
    %36 = arith.truncf %34 : vector<16x64xf32> to vector<16x64xbf16>
    %cst_23 = arith.constant dense<0.000000e+00> : vector<16x64xf32>
    %37 = tpu.matmul %35, %36, %cst_23 {dimension_numbers = #tpu.dot_dimension_numbers<[1], [0], [0], [1], [0, 0, 1, 1], [], []>} : vector<16x16xbf16>, vector<16x64xbf16>, vector<16x64xf32> -> vector<16x64xf32>
    %c0_24 = arith.constant 0 : index
    %c0_25 = arith.constant 0 : index
    %38 = vector.load %arg8[%c0_24, %c0_25] : memref<16x1xf32, #tpu.memory_space<vmem>>, vector<16x1xf32>
    %39 = vector.broadcast %38 : vector<16x1xf32> to vector<16x64xf32>
    %40 = arith.addf %37, %39 : vector<16x64xf32>
    %41 = arith.addf %1, %40 : vector<16x64xf32>
    %c0_26 = arith.constant 0 : index
    %c0_27 = arith.constant 0 : index
    %42 = vector.load %arg9[%c0_26, %c0_27] : memref<16x1xf32, #tpu.memory_space<vmem>>, vector<16x1xf32>
    %43 = vector.broadcast %42 : vector<16x1xf32> to vector<16x64xf32>
    %44 = arith.mulf %41, %43 : vector<16x64xf32>
    %c0_28 = arith.constant 0 : index
    %c0_29 = arith.constant 0 : index
    %45 = vector.load %arg10[%c0_28, %c0_29] : memref<16x1xf32, #tpu.memory_space<vmem>>, vector<16x1xf32>
    %46 = vector.broadcast %45 : vector<16x1xf32> to vector<16x64xf32>
    %47 = arith.addf %44, %46 : vector<16x64xf32>
    %c0_30 = arith.constant 0 : index
    %c0_31 = arith.constant 0 : index
    %48 = vector.load %arg11[%c0_30, %c0_31] : memref<32x16xbf16, #tpu.memory_space<vmem>>, vector<32x16xbf16>
    %49 = arith.truncf %47 : vector<16x64xf32> to vector<16x64xbf16>
    %cst_32 = arith.constant dense<0.000000e+00> : vector<32x64xf32>
    %50 = tpu.matmul %48, %49, %cst_32 {dimension_numbers = #tpu.dot_dimension_numbers<[1], [0], [0], [1], [0, 0, 1, 1], [], []>} : vector<32x16xbf16>, vector<16x64xbf16>, vector<32x64xf32> -> vector<32x64xf32>
    %51 = arith.mulf %50, %50 : vector<32x64xf32>
    %52 = arith.mulf %50, %51 : vector<32x64xf32>
    %cst_33 = arith.constant 4.471500e-02 : f32
    %53 = vector.broadcast %cst_33 : f32 to vector<32x64xf32>
    %54 = arith.mulf %53, %52 : vector<32x64xf32>
    %55 = arith.addf %50, %54 : vector<32x64xf32>
    %cst_34 = arith.constant 0.797884583 : f32
    %56 = vector.broadcast %cst_34 : f32 to vector<32x64xf32>
    %57 = arith.mulf %56, %55 : vector<32x64xf32>
    %58 = math.tanh %57 : vector<32x64xf32>
    %cst_35 = arith.constant 1.000000e+00 : f32
    %59 = vector.broadcast %cst_35 : f32 to vector<32x64xf32>
    %60 = arith.addf %59, %58 : vector<32x64xf32>
    %cst_36 = arith.constant 5.000000e-01 : f32
    %61 = vector.broadcast %cst_36 : f32 to vector<32x64xf32>
    %62 = arith.mulf %61, %60 : vector<32x64xf32>
    %63 = arith.mulf %50, %62 : vector<32x64xf32>
    %c0_37 = arith.constant 0 : index
    %c0_38 = arith.constant 0 : index
    %64 = vector.load %arg12[%c0_37, %c0_38] : memref<16x32xbf16, #tpu.memory_space<vmem>>, vector<16x32xbf16>
    %65 = arith.truncf %63 : vector<32x64xf32> to vector<32x64xbf16>
    %cst_39 = arith.constant dense<0.000000e+00> : vector<16x64xf32>
    %66 = tpu.matmul %64, %65, %cst_39 {dimension_numbers = #tpu.dot_dimension_numbers<[1], [0], [0], [1], [0, 0, 1, 1], [], []>} : vector<16x32xbf16>, vector<32x64xbf16>, vector<16x64xf32> -> vector<16x64xf32>
    %c0_40 = arith.constant 0 : index
    %c0_41 = arith.constant 0 : index
    %67 = vector.load %arg13[%c0_40, %c0_41] : memref<16x1xf32, #tpu.memory_space<vmem>>, vector<16x1xf32>
    %68 = vector.broadcast %67 : vector<16x1xf32> to vector<16x64xf32>
    %69 = arith.addf %66, %68 : vector<16x64xf32>
    %70 = arith.addf %41, %69 : vector<16x64xf32>
    %c0_42 = arith.constant 0 : index
    %c0_43 = arith.constant 0 : index
    %c0_44 = arith.constant 0 : index
    %71 = vector.load %arg16[%c0_42, %c0_43, %c0_44] : memref<1x16x64xf32, #tpu.memory_space<vmem>>, vector<1x16x64xf32>
    %72 = vector.shape_cast %71 : vector<1x16x64xf32> to vector<16x64xf32>
    %73 = vector.shape_cast %70 : vector<16x64xf32> to vector<1x16x64xf32>
    tpu.vector_store %arg16[%c0_42, %c0_43, %c0_44], %73 {strides = array<i32>} : memref<1x16x64xf32, #tpu.memory_space<vmem>>, vector<1x16x64xf32>,
    return
  }
  func.func @transform_0(%arg0: i32, %arg1: i32) -> (i32, i32, i32) {
    %c0_i32 = arith.constant 0 : i32
    %c0_i32_0 = arith.constant 0 : i32
    return %arg0, %c0_i32, %arg1 : i32, i32, i32
  }
  func.func @transform_1(%arg0: i32, %arg1: i32) -> (i32, i32) {
    %c0_i32 = arith.constant 0 : i32
    %c0_i32_0 = arith.constant 0 : i32
    %c0_i32_1 = arith.constant 0 : i32
    return %c0_i32, %c0_i32_0 : i32, i32
  }
  func.func @transform_2(%arg0: i32, %arg1: i32) -> (i32, i32) {
    %c0_i32 = arith.constant 0 : i32
    %c0_i32_0 = arith.constant 0 : i32
    %c0_i32_1 = arith.constant 0 : i32
    return %c0_i32, %c0_i32_0 : i32, i32
  }
  func.func @transform_3(%arg0: i32, %arg1: i32) -> (i32, i32) {
    %c0_i32 = arith.constant 0 : i32
    %c0_i32_0 = arith.constant 0 : i32
    %c0_i32_1 = arith.constant 0 : i32
    return %c0_i32, %c0_i32_0 : i32, i32
  }
  func.func @transform_4(%arg0: i32, %arg1: i32) -> (i32, i32) {
    %c0_i32 = arith.constant 0 : i32
    %c0_i32_0 = arith.constant 0 : i32
    %c0_i32_1 = arith.constant 0 : i32
    return %c0_i32, %c0_i32_0 : i32, i32
  }
  func.func @transform_5(%arg0: i32, %arg1: i32) -> (i32, i32) {
    %c0_i32 = arith.constant 0 : i32
    %c0_i32_0 = arith.constant 0 : i32
    %c0_i32_1 = arith.constant 0 : i32
    return %c0_i32, %c0_i32_0 : i32, i32
  }
  func.func @transform_6(%arg0: i32, %arg1: i32) -> (i32, i32) {
    %c0_i32 = arith.constant 0 : i32
    %c0_i32_0 = arith.constant 0 : i32
    %c0_i32_1 = arith.constant 0 : i32
    return %c0_i32, %c0_i32_0 : i32, i32
  }
  func.func @transform_7(%arg0: i32, %arg1: i32) -> (i32, i32) {
    %c0_i32 = arith.constant 0 : i32
    %c0_i32_0 = arith.constant 0 : i32
    %c0_i32_1 = arith.constant 0 : i32
    return %c0_i32, %c0_i32_0 : i32, i32
  }
  func.func @transform_8(%arg0: i32, %arg1: i32) -> (i32, i32) {
    %c0_i32 = arith.constant 0 : i32
    %c0_i32_0 = arith.constant 0 : i32
    %c0_i32_1 = arith.constant 0 : i32
    return %c0_i32, %c0_i32_0 : i32, i32
  }
  func.func @transform_9(%arg0: i32, %arg1: i32) -> (i32, i32) {
    %c0_i32 = arith.constant 0 : i32
    %c0_i32_0 = arith.constant 0 : i32
    %c0_i32_1 = arith.constant 0 : i32
    return %c0_i32, %c0_i32_0 : i32, i32
  }
  func.func @transform_10(%arg0: i32, %arg1: i32) -> (i32, i32) {
    %c0_i32 = arith.constant 0 : i32
    %c0_i32_0 = arith.constant 0 : i32
    %c0_i32_1 = arith.constant 0 : i32
    return %c0_i32, %c0_i32_0 : i32, i32
  }
  func.func @transform_11(%arg0: i32, %arg1: i32) -> (i32, i32) {
    %c0_i32 = arith.constant 0 : i32
    %c0_i32_0 = arith.constant 0 : i32
    %c0_i32_1 = arith.constant 0 : i32
    return %c0_i32, %c0_i32_0 : i32, i32
  }
  func.func @transform_12(%arg0: i32, %arg1: i32) -> (i32, i32) {
    %c0_i32 = arith.constant 0 : i32
    %c0_i32_0 = arith.constant 0 : i32
    %c0_i32_1 = arith.constant 0 : i32
    return %c0_i32, %c0_i32_0 : i32, i32
  }
  func.func @transform_13(%arg0: i32, %arg1: i32) -> (i32, i32) {
    %c0_i32 = arith.constant 0 : i32
    %c0_i32_0 = arith.constant 0 : i32
    %c0_i32_1 = arith.constant 0 : i32
    return %c0_i32, %c0_i32_0 : i32, i32
  }
  func.func @transform_14(%arg0: i32, %arg1: i32) -> (i32, i32, i32) {
    %c0_i32 = arith.constant 0 : i32
    %c0_i32_0 = arith.constant 0 : i32
    return %arg0, %c0_i32, %arg1 : i32, i32, i32
  }
}

</mosaic_0001>

<bundles_post_ra>
// kernel: tpu_custom_call.1
= control target key start
LH: loop header
LB: loop body
LE: loop exit
PB: predicated region body
PF: predicated region fallthrough
CT: control target
= control target key end

     0   :  { %s1936_s0 = inlined_call_operand.vmem [shape: f32[2,16,64], index: 0, kind: input, shape index: {}]   ;;  %s1937_s1 = inlined_call_operand.vmem [shape: f32[16,1], index: 1, kind: input, shape index: {}]   ;;  %s1938_s2 = inlined_call_operand.vmem [shape: f32[16,1], index: 2, kind: input, shape index: {}]   ;;  %s1939_s3 = inlined_call_operand.vmem [shape: bf16[40,16], index: 3, kind: input, shape index: {}]   ;;  %s1940_s4 = inlined_call_operand.vmem [shape: f32[40,1], index: 4, kind: input, shape index: {}]   ;;  %s1941_s5 = inlined_call_operand.vmem [shape: bf16[16,16], index: 5, kind: input, shape index: {}]   ;;  %s1942_s6 = inlined_call_operand.vmem [shape: f32[16,1], index: 6, kind: input, shape index: {}]   ;;  %s1943_s7 = inlined_call_operand.vmem [shape: f32[16,1], index: 7, kind: input, shape index: {}]   ;;  %s1944_s8 = inlined_call_operand.vmem [shape: f32[16,1], index: 8, kind: input, shape index: {}]   ;;  %s1945_s9 = inlined_call_operand.vmem [shape: bf16[32,16], index: 9, kind: input, shape index: {}]   ;;  %s1946_s10 = inlined_call_operand.vmem [shape: bf16[16,32], index: 10, kind: input, shape index: {}]   ;;  %s1947_s11 = inlined_call_operand.vmem [shape: f32[16,1], index: 11, kind: input, shape index: {}]   ;;  %s1948_s12 = inlined_call_operand.vmem [shape: f32[64,4], index: 12, kind: input, shape index: {}]   ;;  %s1949_s13 = inlined_call_operand.vmem [shape: f32[4,64], index: 13, kind: input, shape index: {}]   ;;  %s1950_s14 = inlined_call_operand.hbm [shape: f32[2,16,64], index: 14, kind: output, shape index: {}]  }
   0x1   :  { %1953 = sst [smem:[#allocation7_spill]] %s1937_s1 }
   0x2   :  { %1954 = sst [smem:[#allocation8_spill]] %s1938_s2 }
   0x3   :  { %1955 = sst [smem:[#allocation9_spill]] %s1940_s4 }
   0x4   :  { %19 = vsyncpa [#allocation3], 0 }
   0x5   :  { %21 = vsyncpa [#allocation3 + $0x1], 0  ;;  %s1660_s29 = smov 0   ;;  %s1662_s30 = smov 0  }
   0x6   :  { %s1664_s15 = smov 0   ;;  %s1666_s16 = smov 0  }
   0x7   :  { %s1668_s17 = smov 0   ;;  %s1670_s18 = smov 0  }
   0x8 LB: > { %1956 = sst [smem:[#allocation5_spill]] %s1557_s29  ;;  %s1274_s19 = sadd.s32 4294967295, %s1577_s18   ;;  %s1577_s18 = sphi %s1670_s18, %s27_s18   ;;  %s1573_s17 = sphi %s1668_s17, %s1969_s17   ;;  %s1569_s16 = sphi %s1666_s16, %s1968_s16   ;;  %s1565_s15 = sphi %s1664_s15, %s1967_s15   ;;  %s1561_s30 = sphi %s1662_s30, %s1966_s30   ;;  %s1557_s29 = sphi %s1660_s29, %s1965_s29  }
   0x9   : > { %s1275_s20 = sadd.s32 4294967294, %s1577_s18   ;;  %s39_s21 = sadd.s32 1, %s1573_s17 }
   0xa   : > { %s349_s22 = sadd.s32 1, %s1565_s15  ;;  %p41_p0 = scmp.ge.s32.totalorder %s39_s21, 2 }
   0xb   : > { %p359_p1 = scmp.ne.s32.totalorder %s1565_s15, %s1561_s30  ;;  %p360_p2 = scmp.eq.s32.totalorder %s1274_s19, 1 }
   0xc   : > { %p365_p3 = scmp.ne.s32.totalorder %s1561_s30, %s1557_s29  ;;  %s1971_s21 = smov (%p41_p0, %s39_s21), 0 }
   0xd   : > { %1957 = sst [smem:[#allocation6_spill]] %s1971_s21  ;;  %p1700_p4 = por %p360_p2, %p359_p1 }
   0xe   : > { %p366_p5 = scmp.eq.s32.totalorder %s1275_s20, 1  ;;  %s344_s24 = ssub.s32 %s1573_s17, %s1971_s21 }
   0xf   : > { %p1278_p6 = scmp.ge.s32.totalorder %s1577_s18, 1  ;;  %p347_p7 = scmp.eq.s32.totalorder %s344_s24, 0 }
  0x10   : > { %p1707_p8 = por %p366_p5, %p365_p3  ;;  %p434_p9 = scmp.lt.s32.totalorder %s1577_s18, 3 }
  0x11   : > { %s1713_s26 = scalar_select %p347_p7, %s1565_s15, %s349_s22  }
  0x12   : > { %p435_p10 = pnand %p1278_p6, %p434_p9 }
  0x13   : > { %s1960_s2 = sld [smem:[#allocation8_spill]] (!%p435_p10)  ;;  %p483_p11 = scmp.lt.s32.totalorder (!%p435_p10), %s1569_s16, 1 }
  0x14   : > { %438 = sbr.rel (%p435_p10) target bundleno = 1608 (0x648), region = 76  ;;  %s1961_s1 = sld [smem:[#allocation7_spill]] (!%p435_p10) }
  0x15   : > { %s1962_s4 = sld [smem:[#allocation9_spill]] (!%p435_p10)  ;;  %s1308_s21 = sshll.u32 (!%p435_p10), %s1569_s16, 8 }
  0x16   : > { %s1582_s28 = smov (!%p435_p10), [#allocation2]  }
  0x19   : > { %v508_v0 = vld [vmem:[%s1960_s2] sm:$0xff]  ;;  %v1579_v2 = vmov 0   ;;  %v509_v3 = vld [vmem:[%s1960_s2 + $0x8] sm:$0xff]  ;;  %v1580_v6 = vmov 0.0   ;;  %vm1581_vm0 = vmmov 0   ;;  %s484_s24 = scalar_select %p483_p11, %s1569_s16, 1  ;;  %v726_v59 = vlaneseq }
  0x1a   : > { %v494_v1 = vld [vmem:[%s1961_s1] sm:$0xff]  ;;  %1481 = vset.pattern.permute.xlu1 %v1579_v2  ;;  %1480 = vset.pattern.permute.xlu0 %v1579_v2  ;;  %v495_v4 = vld [vmem:[%s1961_s1 + $0x8] sm:$0xff]  ;;  %vm571_vm1 = vcmask 130048   ;;  %v1484_v31 = vld [vmem:[%s1939_s3 + $0x10] ss:$0 sps:$4 sm:$0xff]   ;;  %vm637_vm2 = vcmask 516096  }
  0x1b   : > { %512 = vperm.xlu1 %1481, %v508_v0   ;;  %498 = vperm.xlu0 %1480, %v494_v1   ;;  %v532_v5 = vld [vmem:[%s1962_s4 + $0x20] sm:$0xff]  ;;  %v529_v8 = vld [vmem:[%s1962_s4 + $0x8] sm:$0xff]  ;;  %v530_v9 = vld [vmem:[%s1962_s4 + $0x10] sm:$0xff]  ;;  %s1307_s22 = sshll.u32 %s484_s24, 4  ;;  %v727_v60 = vshrl.u32 %v726_v59, 7  ;;  %vm652_vm3 = vcmask 523264  }
  0x1c   : > { %1343 = vmatprep.subr.bf16.mxu0 %v1580_v6  ;;  %1357 = vmatprep.subr.mxu1 %v1580_v6  ;;  %v528_v7 = vld [vmem:[%s1962_s4] sm:$0xff]  ;;  %v531_v10 = vld [vmem:[%s1962_s4 + $0x18] sm:$0xff]  ;;  %v915_v12 = vld [vmem:[%s1942_s6 + $0x8] sm:$0xff]  ;;  %s490_s4 = scalar_lea.vmem %s1936_s0, %s1307_s22  ;;  %vm828_vm4 = vcmask 1043456   ;;  %vm821_vm5 = vcmask 31744   ;;  %vm1132_vm6 = vcmask 261120   ;;  %s1885_s22 = scalar_lea.hbm %s1950_s14, %s1308_s21 }
  0x1d   : > { %1345 = vmatprep.mubr.msk.bf16.mxu0 %vm1581_vm0, %v1580_v6  ;;  %1373 = vmatprep.mubr.msk.f32.mxu1 %vm1581_vm0, %v1580_v6  ;;  %v914_v11 = vld [vmem:[%s1942_s6] sm:$0xff]  ;;  %v978_v14 = vld [vmem:[%s1943_s7 + $0x8] sm:$0xff]  ;;  %v651_v47 = vld [vmem:[%s1948_s12 + $0x38] sm:$0xff]  ;;  %v728_v62 = vsub.s32 0, %v727_v60  ;;  %s480_s2 = sand.u32 1, %s1561_s30   ;;  %s1505_s1 = sshll.u32 %s1582_s28, 4  ;;  %s1506_s1 = int_to_ptr.vmem [resolvable:$false] %s1505_s1 }
  0x1e   : > { %v977_v13 = vld [vmem:[%s1943_s7] sm:$0xff]  ;;  %v1116_v17 = vld [vmem:[%s1947_s11 + $0x8] sm:$0xff]  ;;  %1358 = vmatpush3.msra.mxu1 %v651_v47  ;;  %v650_v49 = vld [vmem:[%s1948_s12 + $0x30] sm:$0xff]  ;;  %s1891_s16 = scalar_lea.sflag [#allocation3], %s480_s2 }
  0x1f   : > { %517 = vperm.xlu1 %1481, %v509_v3   ;;  %503 = vperm.xlu0 %1480, %v495_v4   ;;  %v991_v15 = vld [vmem:[%s1944_s8] sm:$0xff]  ;;  %v1776_v21 = vld [vmem:[%s490_s4 + $0x8] sm:$0xff]  ;;  %v647_v52 = vld [vmem:[%s1948_s12 + $0x18] sm:$0xff] }
  0x20   : > { %v1115_v16 = vld [vmem:[%s1947_s11] sm:$0xff]  ;;  %v1483_v30 = vld [vmem:[%s1939_s3 + $0x8] sm:$0xff]   ;;  %1359 = vmatprep.subr.mxu1 %v1580_v6  ;;  %v646_v53 = vld [vmem:[%s1948_s12 + $0x10] sm:$0xff] }
  0x21   : > { %v1774_v20 = vld [vmem:[%s490_s4] sm:$0xff]  ;;  %v992_v48 = vld [vmem:[%s1944_s8 + $0x8] sm:$0xff]  ;;  %1360 = vmatpush3.msra.mxu1 %v650_v49  ;;  %s1279_s4 = sshll.u32 %s480_s2, 4 }
  0x22   : > { %v1482_v29 = vld [vmem:[%s1939_s3] sm:$0xff]   ;;  %v649_v50 = vld [vmem:[%s1948_s12 + $0x28] sm:$0xff]  ;;  %1361 = vmatprep.subr.mxu1 %v1580_v6  ;;  %s482_s29 = scalar_lea.vmem [#allocation2], %s1279_s4  ;;  %s1507_s4 = scalar_lea.vmem %s1506_s1, 512 }
  0x23   : > { %555 = vperm.xlu0 %1480, %v532_v5   ;;  %v648_v51 = vld [vmem:[%s1948_s12 + $0x20] sm:$0xff]  ;;  %1362 = vmatpush3.msra.mxu1 %v649_v50  ;;  %v645_v54 = vld [vmem:[%s1948_s12 + $0x8] sm:$0xff]  ;;  %s1196_s19 = sshll.u32 %s482_s29, 4  ;;  %s1887_s19 = int_to_ptr.vmem [resolvable:$true] %s1196_s19 }
  0x24   : > { %1363 = vmatprep.subr.mxu1 %v1580_v6  ;;  %v644_v55 = vld [vmem:[%s1948_s12] sm:$0xff]  ;;  %s1501_s27 = scalar_lea.vmem %s1887_s19, 256  ;;  %p1508_p1 = scmp.lt.s32.totalorder %s1887_s19, %s1506_s1 }
  0x25   : > { %1364 = vmatpush3.msra.mxu1 %v648_v51  ;;  %p1502_p12 = scmp.ne.s32.totalorder %s1887_s19, %s1501_s27  ;;  %p1509_p2 = scmp.lt.s32.totalorder %s1507_s4, %s1501_s27 }
  0x26   : > { %1365 = vmatprep.subr.mxu1 %v1580_v6 }
  0x27   : > { %535 = vperm.xlu0 %1480, %v528_v7   ;;  %1366 = vmatpush3.msra.mxu1 %v647_v52  ;;  %v820_v7 = vld [vmem:[%s1949_s13] sm:$0xf]  ;;  %p1503_p13 = pnand %p1502_p12, %p1700_p4  ;;  %p1510_p3 = por %p1509_p2, %p1508_p1 }
  0x28   : > { %1367 = vmatprep.subr.mxu1 %v1580_v6 }
  0x29   : > { %1368 = vmatpush3.msra.mxu1 %v646_v53  ;;  %p1504_p0 = pneg %p1503_p13 }
  0x2a   : > { %1369 = vmatprep.subr.mxu1 %v1580_v6 }
  0x2b   : > { %540 = vperm.xlu0 %1480, %v529_v8   ;;  %1370 = vmatpush3.msra.mxu1 %v645_v54  ;;  %p1511_p5 = pnand %p1510_p3, %p1504_p0 }
  0x2c   : > { %1371 = vmatprep.subr.mxu1 %v1580_v6 }
  0x2d   : > { %1372 = vmatpush3.msra.mxu1 %v644_v55 }
  0x2e   : > { %1395 = vmatprep.subr.msk.mxu1 %vm828_vm4, %v820_v7 }
  0x2f   : > { %545 = vperm.xlu0 %1480, %v530_v9  }
  0x33   : > { %550 = vperm.xlu0 %1480, %v531_v10  }
  0x37   : > { %918 = vperm.xlu0 %1480, %v914_v11  }
  0x3b   : > { %923 = vperm.xlu0 %1480, %v915_v12  }
  0x3f   : > { %981 = vperm.xlu0 %1480, %v977_v13  }
  0x43   : > { %986 = vperm.xlu0 %1480, %v978_v14  }
  0x47   : > { %995 = vperm.xlu0 %1480, %v991_v15  }
  0x4b   : > { %1119 = vperm.xlu0 %1480, %v1115_v16  }
  0x4f   : > { %1124 = vperm.xlu0 %1480, %v1116_v17  }
  0x96   : > { %v513_v18 = vpop.permute.xlu1 %512  ;;  %v499_v19 = vpop.permute.xlu0 %498 }
  0x97   : > { %v506_v22 = vmul.f32 %v499_v19, %v1774_v20 }
  0x99   : > { %v520_v26 = vadd.f32 %v513_v18, %v506_v22 }
  0x9a   : > { %v504_v23 = vpop.permute.xlu0 %503  ;;  %v518_v25 = vpop.permute.xlu1 %517 }
  0x9b   : > { %v507_v24 = vmul.f32 %v504_v23, %v1776_v21 }
  0x9d   : > { %v521_v27 = vadd.f32 %v518_v25, %v507_v24 }
  0x9e   : > { %v556_v40 = vpop.permute.xlu0 %555 }
  0x9f   : > { %v522_v28 = vpack.c.bf16 %v521_v27, %v520_v26 }
  0xa1   : > { %1344 = vmatpush3.bf16.msra.mxu0 %v522_v28 }
  0xa2   : > { %1376 = vmatprep.subr.mxu0 %v651_v47  ;;  %v536_v61 = vpop.permute.xlu0 %535 }
  0xa4   : > { %1346 = vmatmul.mubr.msk.bf16.vlgmr.msra.gmra.mxu0 %vm571_vm1, %v1482_v29  ;;  %v1485_v29 = vld [vmem:[%s1941_s5] sm:$0xff]  }
  0xa5   : > { %1349 = vmatprep.mubr.msk.bf16.mxu0 %vm1581_vm0, %v1580_v6  ;;  %1377 = vmatpush3.msra.mxu0 %v651_v47 }
  0xa6   : > { %1378 = vmatprep.subr.mxu0 %v650_v49  ;;  %v541_v0 = vpop.permute.xlu0 %540 }
  0xa7   : > { %1379 = vmatpush3.msra.mxu0 %v650_v49 }
  0xa8   : > { %1380 = vmatprep.subr.mxu0 %v649_v50 }
  0xa9   : > { %1381 = vmatpush3.msra.mxu0 %v649_v50 }
  0xaa   : > { %1382 = vmatprep.subr.mxu0 %v648_v51  ;;  %v546_v16 = vpop.permute.xlu0 %545 }
  0xab   : > { %1383 = vmatpush3.msra.mxu0 %v648_v51 }
  0xac   : > { %1350 = vmatmul.mubr.msk.bf16.gmra.mxu0 %vm571_vm1, %v1483_v30  ;;  %1384 = vmatprep.subr.mxu0 %v647_v52  ;;  %v1486_v30 = vld [vmem:[%s1945_s9] sm:$0xff]  }
  0xad   : > { %1353 = vmatprep.mubr.msk.bf16.mxu0 %vm1581_vm0, %v1580_v6  ;;  %1385 = vmatpush3.msra.mxu0 %v647_v52 }
  0xae   : > { %1386 = vmatprep.subr.mxu0 %v646_v53  ;;  %v551_v17 = vpop.permute.xlu0 %550 }
  0xaf   : > { %1387 = vmatpush3.msra.mxu0 %v646_v53 }
  0xb0   : > { %1388 = vmatprep.subr.mxu0 %v645_v54 }
  0xb1   : > { %1389 = vmatpush3.msra.mxu0 %v645_v54 }
  0xb2   : > { %1390 = vmatprep.subr.mxu0 %v644_v55 }
  0xb3   : > { %1391 = vmatpush3.msra.mxu0 %v644_v55 }
  0xb4   : > { %1354 = vmatmul.mubr.msk.bf16.gmra.mxu0 %vm571_vm1, %v1484_v31  ;;  %v919_v31 = vpop.permute.xlu0 %918 }
 0x164   : > { %v1796_v32 = vpop.f32.mrf.mxu0 }
 0x165   : > { %v616_v1 = vadd.f32 %v1796_v32, %v536_v61  ;;  %v924_v32 = vpop.permute.xlu0 %923 }
 0x166   : > { %v1347_v33 = vpop.f32.mrf.mxu0 }
 0x168   : > { %v1798_v34 = vpop.f32.mrf.mxu0 }
 0x169   : > { %v619_v2 = vadd.f32 %v1798_v34, %v541_v0  ;;  %v982_v33 = vpop.permute.xlu0 %981 }
 0x16a   : > { %v1348_v35 = vpop.f32.mrf.mxu0 }
 0x16c   : > { %v1800_v36 = vpop.f32.mrf.mxu0 }
 0x16d   : > { %v624_v18 = vadd.f32 %v1800_v36, %v546_v16 }
 0x16e   : > { %v1351_v37 = vpop.f32.mrf.mxu0 }
 0x16f   : > { %v907_v23 = vmax.f32 %v624_v18, 0.0 }
 0x170   : > { %v1802_v38 = vpop.f32.mrf.mxu0 }
 0x171   : > { %v627_v19 = vadd.f32 %v1802_v38, %v551_v17  ;;  %v987_v38 = vpop.permute.xlu0 %986 }
 0x172   : > { %v1352_v39 = vpop.f32.mrf.mxu0 }
 0x173   : > { %v908_v24 = vmax.f32 %v627_v19, 0.0 }
 0x174   : > { %v631_v41 = vpop.f32.mrf.mxu0 }
 0x175   : > { %v632_v42 = vadd.f32 %v631_v41, %v556_v40 }
 0x176   : > { %v1355_v43 = vpop.f32.mrf.mxu0 }
 0x177   : > { %v638_v44 = vsel %vm637_vm2, %v632_v42, -inf }
 0x178   : > { %639 = vmax.xlane.f32.xlu1 %v638_v44  ;;  %v634_v45 = vpop.f32.mrf.mxu0 }
 0x179   : > { %v996_v45 = vpop.permute.xlu0 %995 }
 0x17a   : > { %v1356_v46 = vpop.f32.mrf.mxu0 }
 0x189   : > { %1000 = vperm.xlu1 %1481, %v992_v48  }
 0x201   : > { %v640_v56 = vpop.xlane.xlu1 %639 }
 0x202   : > { %v641_v57 = vsub.f32 %v632_v42, %v640_v56 }
 0x204   : > { %v642_v58 = vmul.f32 1.442695, %v641_v57 }
 0x205   : > { %v1001_v46 = vpop.permute.xlu1 %1000 }
 0x206   : > { %1489 = vpow2.f32 %v642_v58 }
 0x213   : > { %v1490_v63 = vpop.eup %1489 }
 0x214   : > { %1374 = vmatmul.mubr.msk.f32.vlgmr.msra.gmra.mxu1 %vm652_vm3, %v1490_v63  ;;  %v729_v3 = vrot.slane %v1490_v63, %v728_v62 }
 0x215   : > { %1396 = vmatpush3.msk.msra.mxu1 %vm828_vm4, %v820_v7 }
 0x216   : > { %v730_v4 = vmul.f32 %v729_v3, %v616_v1  ;;  %v731_v5 = vmul.f32 %v729_v3, %v619_v2  ;;  %1400 = vmatprep.subr.bf16.mxu1 %v1580_v6 }
 0x218   : > { %1392 = vmatprep.mubr.msk.f32.mxu0 %vm652_vm3, %v730_v4 }
 0x219   : > { %1393 = vmatmul.mubr.msk.f32.vlgmr.msra.gmra.mxu0 %vm652_vm3, %v731_v5 }
 0x21a   : > { %1408 = vmatprep.mubr.msk.bf16.mxu0 %vm571_vm1, %v1486_v30  ;;  %v1488_v30 = vld [vmem:[%s1946_s10] sm:$0xff]  }
 0x2d4   : > { %v722_v8 = vpop.f32.mrf.mxu1 }
 0x2d5   : > { %v816_v9 = vrot.slane %v722_v8, %v728_v62 }
 0x2d6   : > { %v1375_v10 = vpop.f32.mrf.mxu1 }
 0x2d7   : > { %1491 = vrcp.f32 %v816_v9 }
 0x2d9   : > { %v1394_v11 = vpop.f32.mrf.mxu0 }
 0x2db   : > { %v804_v13 = vpop.f32.mrf.mxu0 }
 0x2e4   : > { %v1492_v12 = vpop.eup %1491 }
 0x2e5   : > { %v819_v14 = vmul.f32 %v1492_v12, %v1394_v11  ;;  %v818_v15 = vmul.f32 %v1492_v12, %v804_v13 }
 0x2e7   : > { %1397 = vmatprep.mubr.msk.f32.mxu1 %vm821_vm5, %v818_v15 }
 0x2e8   : > { %1398 = vmatmul.mubr.msk.f32.vlgmr.msra.gmra.mxu1 %vm821_vm5, %v819_v14 }
 0x2e9   : > { %1402 = vmatprep.mubr.msk.bf16.mxu1 %vm1581_vm0, %v1580_v6 }
 0x3a8   : > { %v1399_v22 = vpop.f32.mrf.mxu1 }
 0x3a9   : > { %v910_v26 = vmul.f32 %v1399_v22, %v908_v24 }
 0x3aa   : > { %v898_v25 = vpop.f32.mrf.mxu1 }
 0x3ab   : > { %v909_v27 = vmul.f32 %v907_v23, %v898_v25 }
 0x3ad   : > { %v913_v28 = vpack.c.bf16 %v910_v26, %v909_v27 }
 0x3af   : > { %1401 = vmatpush3.bf16.msra.mxu1 %v913_v28 }
 0x3b0   : > { %1412 = vmatprep.subr.bf16.mxu1 %v1580_v6 }
 0x3b2   : > { %1403 = vmatmul.mubr.msk.bf16.vlgmr.msra.gmra.mxu1 %vm571_vm1, %v1485_v29 }
 0x3b3   : > { %1416 = vmatprep.mubr.msk.bf16.mxu1 %vm1581_vm0, %v1580_v6 }
 0x472   : > { %v968_v34 = vpop.f32.mrf.mxu1 }
 0x473   : > { %v969_v35 = vadd.f32 %v968_v34, %v919_v31  ;;  %v1120_v31 = vpop.permute.xlu0 %1119 }
 0x474   : > { %v1404_v36 = vpop.f32.mrf.mxu1 }
 0x475   : > { %v1863_v37 = vadd.f32 %v969_v35, %v1774_v20  ;;  %v1487_v20 = vld [vmem:[%s1945_s9 + $0x8] sm:$0xff]  }
 0x476   : > { %v971_v39 = vpop.f32.mrf.mxu1 }
 0x477   : > { %v972_v40 = vadd.f32 %v971_v39, %v924_v32  ;;  %v989_v42 = vmul.f32 %v982_v33, %v1863_v37 }
 0x478   : > { %v1405_v41 = vpop.f32.mrf.mxu1 }
 0x479   : > { %v1867_v43 = vadd.f32 %v972_v40, %v1776_v21  ;;  %v1003_v47 = vadd.f32 %v996_v45, %v989_v42 }
 0x47b   : > { %v990_v44 = vmul.f32 %v987_v38, %v1867_v43 }
 0x47d   : > { %v1004_v48 = vadd.f32 %v1001_v46, %v990_v44 }
 0x47f   : > { %v1009_v49 = vpack.c.bf16 %v1004_v48, %v1003_v47 }
 0x481   : > { %1406 = vmatprep.subr.bf16.mxu0 %v1009_v49 }
 0x482   : > { %1407 = vmatpush3.bf16.msra.mxu0 %v1009_v49 }
 0x485   : > { %1409 = vmatmul.mubr.msk.bf16.vlgmr.msra.gmra.mxu0 %vm571_vm1, %v1487_v20 }
 0x545   : > { %v1410_v50 = vpop.f32.mrf.mxu0 }
 0x546   : > { %v1077_v51 = vmul.f32 %v1410_v50, %v1410_v50 }
 0x547   : > { %v1060_v52 = vpop.f32.mrf.mxu0 }
 0x548   : > { %v1081_v21 = vmul.f32 %v1410_v50, %v1077_v51  ;;  %v1075_v53 = vmul.f32 %v1060_v52, %v1060_v52 }
 0x549   : > { %v1411_v54 = vpop.f32.mrf.mxu0 }
 0x54a   : > { %v1085_v55 = vmul.f32 0.044715, %v1081_v21  ;;  %v1079_v56 = vmul.f32 %v1075_v53, %v1060_v52  ;;  %v1078_v57 = vmul.f32 %v1411_v54, %v1411_v54 }
 0x54b   : > { %v1063_v58 = vpop.f32.mrf.mxu0 }
 0x54c   : > { %v1089_v59 = vadd.f32 %v1410_v50, %v1085_v55  ;;  %v1083_v60 = vmul.f32 0.044715, %v1079_v56  ;;  %v1082_v61 = vmul.f32 %v1411_v54, %v1078_v57  ;;  %v1076_v62 = vmul.f32 %v1063_v58, %v1063_v58 }
 0x54e   : > { %v1093_v63 = vmul.f32 0.7978846, %v1089_v59  ;;  %v1087_v0 = vadd.f32 %v1083_v60, %v1060_v52  ;;  %v1086_v1 = vmul.f32 0.044715, %v1082_v61  ;;  %v1080_v2 = vmul.f32 %v1076_v62, %v1063_v58 }
 0x550   : > { %1493 = vtanh.f32 %v1093_v63  ;;  %v1091_v3 = vmul.f32 0.7978846, %v1087_v0  ;;  %v1090_v4 = vadd.f32 %v1411_v54, %v1086_v1  ;;  %v1084_v5 = vmul.f32 0.044715, %v1080_v2 }
 0x552   : > { %1495 = vtanh.f32 %v1091_v3  ;;  %v1094_v7 = vmul.f32 0.7978846, %v1090_v4  ;;  %v1088_v8 = vadd.f32 %v1084_v5, %v1063_v58 }
 0x554   : > { %1497 = vtanh.f32 %v1094_v7  ;;  %v1092_v9 = vmul.f32 0.7978846, %v1088_v8 }
 0x556   : > { %1499 = vtanh.f32 %v1092_v9 }
 0x55d   : > { %v1494_v10 = vpop.eup %1493 }
 0x55e   : > { %v1101_v11 = vadd.f32 1.0, %v1494_v10 }
 0x55f   : > { %v1496_v12 = vpop.eup %1495 }
 0x560   : > { %v1105_v14 = vmul.f32 0.5, %v1101_v11  ;;  %v1099_v15 = vadd.f32 1.0, %v1496_v12 }
 0x561   : > { %v1498_v13 = vpop.eup %1497 }
 0x562   : > { %v1102_v16 = vadd.f32 1.0, %v1498_v13  ;;  %v1109_v22 = vmul.f32 %v1410_v50, %v1105_v14  ;;  %v1103_v23 = vmul.f32 0.5, %v1099_v15 }
 0x563   : > { %v1500_v17 = vpop.eup %1499 }
 0x564   : > { %v1106_v18 = vmul.f32 0.5, %v1102_v16  ;;  %v1100_v19 = vadd.f32 1.0, %v1500_v17  ;;  %v1107_v28 = vmul.f32 %v1103_v23, %v1060_v52 }
 0x566   : > { %v1110_v24 = vmul.f32 %v1411_v54, %v1106_v18  ;;  %v1104_v25 = vmul.f32 0.5, %v1100_v19 }
 0x568   : > { %v1108_v26 = vmul.f32 %v1104_v25, %v1063_v58  ;;  %v1114_v27 = vpack.c.bf16 %v1110_v24, %v1109_v22 }
 0x56a   : > { %1413 = vmatpush3.bf16.msra.mxu1 %v1114_v27  ;;  %v1113_v29 = vpack.c.bf16 %v1108_v26, %v1107_v28 }
 0x56b   : > { %1414 = vmatprep.subr.bf16.mxu1 %v1580_v6  ;;  %v1125_v6 = vpop.permute.xlu0 %1124 }
 0x56e   : > { %1415 = vmatpush3.bf16.msra.mxu1 %v1113_v29 }
 0x571   : > { %1417 = vmatmul.mubr.msk.bf16.vlgmr.msra.gmra.mxu1 %vm1132_vm6, %v1488_v30 }
 0x631   : > { %v1170_v32 = vpop.f32.mrf.mxu1 }
 0x632   : > { %v1171_v33 = vadd.f32 %v1170_v32, %v1120_v31 }
 0x633   : > { %v1418_v34 = vpop.f32.mrf.mxu1 }
 0x634   : > { %v1177_v35 = vadd.f32 %v1171_v33, %v1863_v37 }
 0x635   : > { %v1173_v36 = vpop.f32.mrf.mxu1 }
 0x636   : > { %1179 = vst.msk [vmem:[%s482_s29] sm:$0xff] %vm652_vm3, %v1177_v35  ;;  %v1174_v38 = vadd.f32 %v1173_v36, %v1125_v6 }
 0x637   : > { %v1419_v39 = vpop.f32.mrf.mxu1 }
 0x638   : > { %v1178_v37 = vadd.f32 %v1174_v38, %v1867_v43 }
 0x63a   : > { %1180 = vst.msk [vmem:[%s482_s29 + $0x8] sm:$0xff] %vm652_vm3, %v1178_v37 }
 0x63b   : > { %1514 = shalt.err (!%p1511_p5)
}
 0x63c   : > { %s1515_s2 = scalar_lea.hbm %s1885_s22, 256  ;;  %s1519_s20 = scalar_lea.hbm %s1950_s14, 512 }
 0x63d   : > { %p1516_p6 = scmp.ne.s32.totalorder %s1885_s22, %s1515_s2  ;;  %p1520_p10 = scmp.lt.s32.totalorder %s1885_s22, %s1950_s14 }
 0x63e   : > { %p1521_p11 = scmp.lt.s32.totalorder %s1519_s20, %s1515_s2 }
 0x63f   : > { %p1517_p7 = pnand %p1516_p6, %p1700_p4 }
 0x640   : > { %p1522_p12 = por %p1521_p11, %p1520_p10 }
 0x641   : > { %p1518_p9 = pneg %p1517_p7 }
 0x643   : > { %p1523_p13 = pnand %p1522_p12, %p1518_p9 }
 0x645   : > { %1526 = shalt.err (!%p1523_p13)
}
 0x646   : > { %s1583_s27 = smov 128   ;;  %s1584_s1 = smov 8  }
 0x647   : > { %1420 = dma.vmem_to_hbm [thread:$0]  (%p1700_p4), %s1887_s19, 256, %s1885_s22, %s1891_s16, %s1583_s27, %s1583_s27, %s1584_s1  }
 0x648 PF: > { %s1963_s4 = sld [smem:[#allocation5_spill]]  ;;  %p1426_p0 = scmp.ge.s32.totalorder %s1577_s18, 2 }
 0x64a   : > { %p1423_p1 = pnand %p1426_p0, %p1707_p8 }
 0x64c   : > { %p1424_p2 = pneg %p1423_p1 }
 0x64e   : > { %s1211_s29 = sand.u32 1, %s1963_s4  }
 0x64f   : > { %s1212_s2 = scalar_lea.sflag [#allocation3], %s1211_s29 }
 0x650   : > { %1552 = dma.done.wait (%p1424_p2), %s1212_s2, 256  }
 0x651   : > { %1554 = vsyncadd (%p1424_p2), %s1212_s2, 4294967040  ;;  %s27_s18 = sadd.s32 1, %s1577_s18   ;;  %s1964_s23 = sld [smem:[#allocation6_spill]] }
 0x652   : > { %p24_p3 = scmp.ge.s32.totalorder %s27_s18, 4   ;;  %s1965_s29 = smov %s1561_s30 }
 0x653   : > { %s1966_s30 = smov %s1565_s15  ;;  %s1967_s15 = smov %s1713_s26 }
 0x654   : > { %s1968_s16 = smov %s1573_s17  ;;  %26 = sbr.rel (!%p24_p3) target bundleno = 8 (0x8), region = 111 }
 0x657   : > { %s1969_s17 = smov %s1964_s23 }
 0x659   :  { %1217 = vsyncpa [#allocation3], 1 }
 0x65a   :  { %1219 = vsyncpa [#allocation3 + $0x1], 1 }

</bundles_post_ra>
